<compile_context>
chip_gen: v6e
topology: v6e:2x2x1
jax: 0.10.0
libtpu: 0.0.40
codegen_flags: <defaults>
</compile_context>

<pallas_src>
import jax
import jax.numpy as jnp
from jax.experimental import pallas as pl
from jax.experimental.pallas import tpu as pltpu


# ---------------------------------------------------------------------------
# Fused Pallas kernel: hidden MLP (Linear + shared PReLU) + mu / std heads
# ---------------------------------------------------------------------------

def _make_fused_kernel(n_hidden):
    """Kernel args:
       (alpha_ref[SMEM], x_ref, w1, b1, ..., wn, bn, wmu, bmu, wls, bls,
        mu_ref, std_ref)
       Everything is feature-major: x_ref is [state_dim, TB], outputs are
       [A, TB]; the batch tile TB lives in the lane dimension."""

    def kernel(alpha_ref, x_ref, *refs):
        mu_ref, std_ref = refs[-2], refs[-1]
        wmu_ref, bmu_ref = refs[-6], refs[-5]
        wls_ref, bls_ref = refs[-4], refs[-3]

        alpha = alpha_ref[0, 0]          # shared PReLU weight (scalar, SMEM)
        cdt = x_ref.dtype                # MXU input dtype (f32 or bf16)
        h = x_ref[...]                   # [state_dim, TB]

        # Hidden stack (unrolled at trace time; n_hidden is static).
        for li in range(n_hidden):
            w = refs[2 * li][...]        # [out, in]   PyTorch order, no transpose
            b = refs[2 * li + 1][...]    # [out, 1]    broadcasts over lanes (batch)
            y = jnp.dot(w, h, preferred_element_type=jnp.float32) + b
            # Single-parameter PReLU (same alpha for every layer, like the module).
            h = jnp.where(y > 0, y, alpha * y).astype(cdt)

        # Heads: two small matmuls into two separate lane-dense output slabs.
        mu = jnp.dot(wmu_ref[...], h, preferred_element_type=jnp.float32) + bmu_ref[...]
        mu_ref[...] = mu.astype(mu_ref.dtype)

        ls = jnp.dot(wls_ref[...], h, preferred_element_type=jnp.float32) + bls_ref[...]
        # clamp(-5, 2) BEFORE exp (matches the PyTorch module; also keeps exp safe).
        std_ref[...] = jnp.exp(jnp.clip(ls, -5.0, 2.0)).astype(std_ref.dtype)

    return kernel


# ---------------------------------------------------------------------------
# Wrapper: single pallas_call, batch grid with single-buffered resident weights
# ---------------------------------------------------------------------------

def policy_net_continuous_forward(params, x, *, batch_tile=1024,
                                  compute_dtype=jnp.float32):
    B, state_dim = x.shape
    hidden = params["hidden"]
    n_hidden = len(hidden)
    A = params["fc_mu_w"].shape[0]
    cdt = jnp.dtype(compute_dtype)

    # Feature-major input: one transpose of x in the wrapper (instead of
    # transposing every weight); batch lands in the lane dimension.
    x_fm = x.T.astype(cdt)                                  # [state_dim, B]

    # Weights stay PyTorch [out, in]; biases become [out, 1] and stay f32
    # (added after the f32 MXU accumulate).
    weights = []
    for (w, b) in hidden:
        weights.append(w.astype(cdt))
        weights.append(b.astype(jnp.float32)[:, None])
    weights.append(params["fc_mu_w"].astype(cdt))
    weights.append(params["fc_mu_b"].astype(jnp.float32)[:, None])
    weights.append(params["fc_log_std_w"].astype(cdt))
    weights.append(params["fc_log_std_b"].astype(jnp.float32)[:, None])

    # Batch tiling.  Batch is the lane dim, so a tile must be a multiple of 128
    # unless it spans the whole batch.  No jnp.pad: use a cdiv grid — every
    # column (row of x) is independent through the whole network, so the
    # ragged-tail block's out-of-bounds columns are garbage-in/garbage-out and
    # their stores are masked by Pallas.
    batch_tile = max(128, (batch_tile // 128) * 128)
    if B <= 128:
        TB = B                           # single program; tile == full batch
    else:
        # >= 2 grid steps so both v7x TensorCores get work; tile <= batch_tile.
        TB = min(batch_tile, 128 * max(1, pl.cdiv(B, 128) // 2))
    grid = (pl.cdiv(B, TB),)

    in_specs = [
        # Shared PReLU alpha: true scalar -> SMEM, no VMEM vector load.
        pl.BlockSpec((1, 1), lambda i: (0, 0),
                     memory_space=pltpu.MemorySpace.SMEM),
        # x tiled over the batch (lane) axis.
        pl.BlockSpec((state_dim, TB), lambda i: (0, i)),
    ]
    for wb in weights:
        # Constant block across the batch grid -> VMEM-resident, single-buffered
        # (halves resident weight footprint; matters for v7x's 64 MiB VMEM).
        in_specs.append(pl.BlockSpec(wb.shape, lambda i: (0, 0),
                                     pipeline_mode=pl.Buffered(buffer_count=1)))

    # Explicit VMEM budget: single-buffered weights + double-buffered x / mu /
    # std tiles + headroom for live activation temporaries.
    wb_bytes = sum(int(w.size) * w.dtype.itemsize for w in weights)
    io_bytes = 2 * (cdt.itemsize * state_dim * TB + 2 * 4 * A * TB)
    max_feat = max([state_dim, A] + [w.shape[0] for (w, _) in hidden])
    act_bytes = 4 * max_feat * TB * 4
    est = wb_bytes + io_bytes + act_bytes + (8 << 20)
    vmem_limit = int(min(max(est, 32 << 20), 128 << 20))

    mu_fm, std_fm = pl.pallas_call(
        _make_fused_kernel(n_hidden),
        out_shape=(jax.ShapeDtypeStruct((A, B), jnp.float32),
                   jax.ShapeDtypeStruct((A, B), jnp.float32)),
        grid=grid,
        in_specs=in_specs,
        out_specs=(pl.BlockSpec((A, TB), lambda i: (0, i)),
                   pl.BlockSpec((A, TB), lambda i: (0, i))),
        compiler_params=pltpu.CompilerParams(
            dimension_semantics=("parallel",),
            vmem_limit_bytes=vmem_limit),
    )(params["prelu_alpha"], x_fm, *weights)

    # Back to the PyTorch [batch, action_dim] interface (tiny A x B transposes).
    return mu_fm.T, std_fm.T


forward_jit = jax.jit(policy_net_continuous_forward,
                      static_argnames=("batch_tile", "compute_dtype"))


# ---------------------------------------------------------------------------
# Parameter construction (mirrors the PyTorch __init__ shapes / inits)
# ---------------------------------------------------------------------------

def init_params(key, state_dim, hidden_dim, action_dim):
    params = {"hidden": []}
    prev = state_dim
    for h in hidden_dim:
        key, kw, kb = jax.random.split(key, 3)
        bound = 1.0 / jnp.sqrt(prev)
        w = jax.random.uniform(kw, (h, prev), jnp.float32, -bound, bound)
        b = jax.random.uniform(kb, (h,), jnp.float32, -bound, bound)
        params["hidden"].append((w, b))
        prev = h

    def xavier_normal(k, out_d, in_d, gain):
        std = gain * jnp.sqrt(2.0 / (in_d + out_d))
        return std * jax.random.normal(k, (out_d, in_d), jnp.float32)

    key, kmu, kls, kbm, kbl = jax.random.split(key, 5)
    bound = 1.0 / jnp.sqrt(prev)
    params["fc_mu_w"] = xavier_normal(kmu, action_dim, prev, 0.01)
    params["fc_mu_b"] = jax.random.uniform(kbm, (action_dim,), jnp.float32, -bound, bound)
    params["fc_log_std_w"] = xavier_normal(kls, action_dim, prev, 0.01)
    params["fc_log_std_b"] = jax.random.uniform(kbl, (action_dim,), jnp.float32, -bound, bound)
    params["prelu_alpha"] = jnp.full((1, 1), 0.25, jnp.float32)   # PReLU default 0.25
    return params


# Pure-JAX reference for sanity checking.
def _reference_forward(params, x):
    h = x
    a = params["prelu_alpha"][0, 0]
    for (w, b) in params["hidden"]:
        y = h @ w.T + b
        h = jnp.where(y > 0, y, a * y)
    mu = h @ params["fc_mu_w"].T + params["fc_mu_b"]
    ls = jnp.clip(h @ params["fc_log_std_w"].T + params["fc_log_std_b"], -5.0, 2.0)
    return mu, jnp.exp(ls)


if __name__ == "__main__":
    state_dim = 8
    hidden_dim = (32, 32)
    action_dim = 4

    key = jax.random.PRNGKey(0)
    key, kx, kx2, kx3 = jax.random.split(key, 4)
    params = init_params(key, state_dim, hidden_dim, action_dim)

    # --- small batch: single program, full-batch tile ---
    batch = 4
    x = jax.random.normal(kx, (batch, state_dim), jnp.float32)
    mu, std = forward_jit(params, x)
    jax.block_until_ready((mu, std))
    mu_ref, std_ref = _reference_forward(params, x)
    assert mu.shape == (batch, action_dim) and std.shape == (batch, action_dim)
    assert jnp.allclose(mu, mu_ref, atol=1e-5, rtol=1e-5)
    assert jnp.allclose(std, std_ref, atol=1e-5, rtol=1e-5)
    assert bool(jnp.all(std > 0))

    # --- gridded batch: >=2 grid steps (v7x megacore), ragged tail, no pad ---
    big_batch = 300
    xb = jax.random.normal(kx2, (big_batch, state_dim), jnp.float32)
    mu_b, std_b = forward_jit(params, xb)
    jax.block_until_ready((mu_b, std_b))
    mu_b_ref, std_b_ref = _reference_forward(params, xb)
    assert mu_b.shape == (big_batch, action_dim) and std_b.shape == (big_batch, action_dim)
    assert jnp.allclose(mu_b, mu_b_ref, atol=1e-5, rtol=1e-5)
    assert jnp.allclose(std_b, std_b_ref, atol=1e-5, rtol=1e-5)

    # --- bf16 streaming path (bandwidth-limited v5e/v6e), f32 MXU accumulate ---
    xc = jax.random.normal(kx3, (256, state_dim), jnp.float32)
    mu_c, std_c = forward_jit(params, xc, compute_dtype=jnp.bfloat16)
    jax.block_until_ready((mu_c, std_c))
    mu_c_ref, std_c_ref = _reference_forward(params, xc)
    assert jnp.allclose(mu_c, mu_c_ref, atol=5e-2, rtol=5e-2)
    assert jnp.allclose(std_c, std_c_ref, atol=5e-2, rtol=5e-2)
    assert bool(jnp.all(std_c > 0))

    print("KERNEL_OK")
</pallas_src>

<mosaic_0001>
module attributes {stable_mosaic.version = 11 : i64} {
  func.func @kernel(%arg0: i32, %arg1: memref<1x1xf32, #tpu.memory_space<smem>>, %arg2: memref<8x4xf32, #tpu.memory_space<vmem>>, %arg3: memref<32x8xf32, #tpu.memory_space<vmem>>, %arg4: memref<32x1xf32, #tpu.memory_space<vmem>>, %arg5: memref<32x32xf32, #tpu.memory_space<vmem>>, %arg6: memref<32x1xf32, #tpu.memory_space<vmem>>, %arg7: memref<4x32xf32, #tpu.memory_space<vmem>>, %arg8: memref<4x1xf32, #tpu.memory_space<vmem>>, %arg9: memref<4x32xf32, #tpu.memory_space<vmem>>, %arg10: memref<4x1xf32, #tpu.memory_space<vmem>>, %arg11: memref<4x4xf32, #tpu.memory_space<vmem>>, %arg12: memref<4x4xf32, #tpu.memory_space<vmem>>) attributes {dimension_semantics = [#tpu.dimension_semantics<parallel>], iteration_bounds = array<i64: 1>, scalar_prefetch = 0 : i64, scratch_operands = 0 : i64, tpu.core_type = #tpu.core_type<tc>, window_params = [{transform_indices = @transform_0, window_bounds = array<i64: 1, 1>}, {transform_indices = @transform_1, window_bounds = array<i64: 8, 4>}, {pipeline_mode = #tpu.pipeline_mode<synchronous>, transform_indices = @transform_2, window_bounds = array<i64: 32, 8>}, {pipeline_mode = #tpu.pipeline_mode<synchronous>, transform_indices = @transform_3, window_bounds = array<i64: 32, 1>}, {pipeline_mode = #tpu.pipeline_mode<synchronous>, transform_indices = @transform_4, window_bounds = array<i64: 32, 32>}, {pipeline_mode = #tpu.pipeline_mode<synchronous>, transform_indices = @transform_5, window_bounds = array<i64: 32, 1>}, {pipeline_mode = #tpu.pipeline_mode<synchronous>, transform_indices = @transform_6, window_bounds = array<i64: 4, 32>}, {pipeline_mode = #tpu.pipeline_mode<synchronous>, transform_indices = @transform_7, window_bounds = array<i64: 4, 1>}, {pipeline_mode = #tpu.pipeline_mode<synchronous>, transform_indices = @transform_8, window_bounds = array<i64: 4, 32>}, {pipeline_mode = #tpu.pipeline_mode<synchronous>, transform_indices = @transform_9, window_bounds = array<i64: 4, 1>}, {transform_indices = @transform_10, window_bounds = array<i64: 4, 4>}, {transform_indices = @transform_11, window_bounds = array<i64: 4, 4>}]} {
    %c0 = arith.constant 0 : index
    %c0_0 = arith.constant 0 : index
    %0 = memref.load %arg1[%c0, %c0_0] : memref<1x1xf32, #tpu.memory_space<smem>>
    %c0_1 = arith.constant 0 : index
    %c0_2 = arith.constant 0 : index
    %1 = vector.load %arg2[%c0_1, %c0_2] : memref<8x4xf32, #tpu.memory_space<vmem>>, vector<8x4xf32>
    %c0_3 = arith.constant 0 : index
    %c0_4 = arith.constant 0 : index
    %2 = vector.load %arg3[%c0_3, %c0_4] : memref<32x8xf32, #tpu.memory_space<vmem>>, vector<32x8xf32>
    %c0_5 = arith.constant 0 : index
    %c0_6 = arith.constant 0 : index
    %3 = vector.load %arg4[%c0_5, %c0_6] : memref<32x1xf32, #tpu.memory_space<vmem>>, vector<32x1xf32>
    %cst = arith.constant dense<0.000000e+00> : vector<32x4xf32>
    %4 = tpu.matmul %2, %1, %cst {dimension_numbers = #tpu.dot_dimension_numbers<[1], [0], [0], [1], [0, 0, 1, 1], [], []>} : vector<32x8xf32>, vector<8x4xf32>, vector<32x4xf32> -> vector<32x4xf32>
    %5 = vector.broadcast %3 : vector<32x1xf32> to vector<32x4xf32>
    %6 = arith.addf %4, %5 : vector<32x4xf32>
    %cst_7 = arith.constant 0.000000e+00 : f32
    %7 = vector.broadcast %cst_7 : f32 to vector<32x4xf32>
    %8 = arith.cmpf ogt, %6, %7 : vector<32x4xf32>
    %9 = vector.broadcast %0 : f32 to vector<32x4xf32>
    %10 = arith.mulf %9, %6 : vector<32x4xf32>
    %11 = arith.select %8, %6, %10 : vector<32x4xi1>, vector<32x4xf32>
    %c0_8 = arith.constant 0 : index
    %c0_9 = arith.constant 0 : index
    %12 = vector.load %arg5[%c0_8, %c0_9] : memref<32x32xf32, #tpu.memory_space<vmem>>, vector<32x32xf32>
    %c0_10 = arith.constant 0 : index
    %c0_11 = arith.constant 0 : index
    %13 = vector.load %arg6[%c0_10, %c0_11] : memref<32x1xf32, #tpu.memory_space<vmem>>, vector<32x1xf32>
    %cst_12 = arith.constant dense<0.000000e+00> : vector<32x4xf32>
    %14 = tpu.matmul %12, %11, %cst_12 {dimension_numbers = #tpu.dot_dimension_numbers<[1], [0], [0], [1], [0, 0, 1, 1], [], []>} : vector<32x32xf32>, vector<32x4xf32>, vector<32x4xf32> -> vector<32x4xf32>
    %15 = vector.broadcast %13 : vector<32x1xf32> to vector<32x4xf32>
    %16 = arith.addf %14, %15 : vector<32x4xf32>
    %cst_13 = arith.constant 0.000000e+00 : f32
    %17 = vector.broadcast %cst_13 : f32 to vector<32x4xf32>
    %18 = arith.cmpf ogt, %16, %17 : vector<32x4xf32>
    %19 = vector.broadcast %0 : f32 to vector<32x4xf32>
    %20 = arith.mulf %19, %16 : vector<32x4xf32>
    %21 = arith.select %18, %16, %20 : vector<32x4xi1>, vector<32x4xf32>
    %c0_14 = arith.constant 0 : index
    %c0_15 = arith.constant 0 : index
    %22 = vector.load %arg7[%c0_14, %c0_15] : memref<4x32xf32, #tpu.memory_space<vmem>>, vector<4x32xf32>
    %cst_16 = arith.constant dense<0.000000e+00> : vector<4x4xf32>
    %23 = tpu.matmul %22, %21, %cst_16 {dimension_numbers = #tpu.dot_dimension_numbers<[1], [0], [0], [1], [0, 0, 1, 1], [], []>} : vector<4x32xf32>, vector<32x4xf32>, vector<4x4xf32> -> vector<4x4xf32>
    %c0_17 = arith.constant 0 : index
    %c0_18 = arith.constant 0 : index
    %24 = vector.load %arg8[%c0_17, %c0_18] : memref<4x1xf32, #tpu.memory_space<vmem>>, vector<4x1xf32>
    %25 = vector.broadcast %24 : vector<4x1xf32> to vector<4x4xf32>
    %26 = arith.addf %23, %25 : vector<4x4xf32>
    %c0_19 = arith.constant 0 : index
    %c0_20 = arith.constant 0 : index
    %27 = vector.load %arg11[%c0_19, %c0_20] : memref<4x4xf32, #tpu.memory_space<vmem>>, vector<4x4xf32>
    tpu.vector_store %arg11[%c0_19, %c0_20], %26 {strides = array<i32>} : memref<4x4xf32, #tpu.memory_space<vmem>>, vector<4x4xf32>,
    %c0_21 = arith.constant 0 : index
    %c0_22 = arith.constant 0 : index
    %28 = vector.load %arg9[%c0_21, %c0_22] : memref<4x32xf32, #tpu.memory_space<vmem>>, vector<4x32xf32>
    %cst_23 = arith.constant dense<0.000000e+00> : vector<4x4xf32>
    %29 = tpu.matmul %28, %21, %cst_23 {dimension_numbers = #tpu.dot_dimension_numbers<[1], [0], [0], [1], [0, 0, 1, 1], [], []>} : vector<4x32xf32>, vector<32x4xf32>, vector<4x4xf32> -> vector<4x4xf32>
    %c0_24 = arith.constant 0 : index
    %c0_25 = arith.constant 0 : index
    %30 = vector.load %arg10[%c0_24, %c0_25] : memref<4x1xf32, #tpu.memory_space<vmem>>, vector<4x1xf32>
    %31 = vector.broadcast %30 : vector<4x1xf32> to vector<4x4xf32>
    %32 = arith.addf %29, %31 : vector<4x4xf32>
    %cst_26 = arith.constant -5.000000e+00 : f32
    %cst_27 = arith.constant 2.000000e+00 : f32
    %33 = vector.broadcast %cst_26 : f32 to vector<4x4xf32>
    %34 = arith.maximumf %33, %32 : vector<4x4xf32>
    %35 = vector.broadcast %cst_27 : f32 to vector<4x4xf32>
    %36 = arith.minimumf %35, %34 : vector<4x4xf32>
    %37 = math.exp %36 : vector<4x4xf32>
    %c0_28 = arith.constant 0 : index
    %c0_29 = arith.constant 0 : index
    %38 = vector.load %arg12[%c0_28, %c0_29] : memref<4x4xf32, #tpu.memory_space<vmem>>, vector<4x4xf32>
    tpu.vector_store %arg12[%c0_28, %c0_29], %37 {strides = array<i32>} : memref<4x4xf32, #tpu.memory_space<vmem>>, vector<4x4xf32>,
    return
  }
  func.func @transform_0(%arg0: i32) -> (i32, i32) {
    %c0_i32 = arith.constant 0 : i32
    %c0_i32_0 = arith.constant 0 : i32
    %c0_i32_1 = arith.constant 0 : i32
    return %c0_i32, %c0_i32_0 : i32, i32
  }
  func.func @transform_1(%arg0: i32) -> (i32, i32) {
    %c0_i32 = arith.constant 0 : i32
    %c0_i32_0 = arith.constant 0 : i32
    return %c0_i32, %arg0 : i32, i32
  }
  func.func @transform_2(%arg0: i32) -> (i32, i32) {
    %c0_i32 = arith.constant 0 : i32
    %c0_i32_0 = arith.constant 0 : i32
    %c0_i32_1 = arith.constant 0 : i32
    return %c0_i32, %c0_i32_0 : i32, i32
  }
  func.func @transform_3(%arg0: i32) -> (i32, i32) {
    %c0_i32 = arith.constant 0 : i32
    %c0_i32_0 = arith.constant 0 : i32
    %c0_i32_1 = arith.constant 0 : i32
    return %c0_i32, %c0_i32_0 : i32, i32
  }
  func.func @transform_4(%arg0: i32) -> (i32, i32) {
    %c0_i32 = arith.constant 0 : i32
    %c0_i32_0 = arith.constant 0 : i32
    %c0_i32_1 = arith.constant 0 : i32
    return %c0_i32, %c0_i32_0 : i32, i32
  }
  func.func @transform_5(%arg0: i32) -> (i32, i32) {
    %c0_i32 = arith.constant 0 : i32
    %c0_i32_0 = arith.constant 0 : i32
    %c0_i32_1 = arith.constant 0 : i32
    return %c0_i32, %c0_i32_0 : i32, i32
  }
  func.func @transform_6(%arg0: i32) -> (i32, i32) {
    %c0_i32 = arith.constant 0 : i32
    %c0_i32_0 = arith.constant 0 : i32
    %c0_i32_1 = arith.constant 0 : i32
    return %c0_i32, %c0_i32_0 : i32, i32
  }
  func.func @transform_7(%arg0: i32) -> (i32, i32) {
    %c0_i32 = arith.constant 0 : i32
    %c0_i32_0 = arith.constant 0 : i32
    %c0_i32_1 = arith.constant 0 : i32
    return %c0_i32, %c0_i32_0 : i32, i32
  }
  func.func @transform_8(%arg0: i32) -> (i32, i32) {
    %c0_i32 = arith.constant 0 : i32
    %c0_i32_0 = arith.constant 0 : i32
    %c0_i32_1 = arith.constant 0 : i32
    return %c0_i32, %c0_i32_0 : i32, i32
  }
  func.func @transform_9(%arg0: i32) -> (i32, i32) {
    %c0_i32 = arith.constant 0 : i32
    %c0_i32_0 = arith.constant 0 : i32
    %c0_i32_1 = arith.constant 0 : i32
    return %c0_i32, %c0_i32_0 : i32, i32
  }
  func.func @transform_10(%arg0: i32) -> (i32, i32) {
    %c0_i32 = arith.constant 0 : i32
    %c0_i32_0 = arith.constant 0 : i32
    return %c0_i32, %arg0 : i32, i32
  }
  func.func @transform_11(%arg0: i32) -> (i32, i32) {
    %c0_i32 = arith.constant 0 : i32
    %c0_i32_0 = arith.constant 0 : i32
    return %c0_i32, %arg0 : i32, i32
  }
}

</mosaic_0001>

<bundles_post_ra>
// kernel: policy_net_continuous_forward.1
= control target key start
LH: loop header
LB: loop body
LE: loop exit
PB: predicated region body
PF: predicated region fallthrough
CT: control target
= control target key end

     0   :  { %vm68_vm0 = vcmask 64512   ;;  %v576_v3 = vmov 0   ;;  %vm207_vm1 = vcmask 261120   ;;  %v577_v41 = vmov 0.0   ;;  %s721_s1 = inlined_call_operand.vmem [shape: f32[8,4], index: 1, kind: input, shape index: {}]   ;;  %s722_s2 = inlined_call_operand.vmem [shape: f32[32,8], index: 2, kind: input, shape index: {}]   ;;  %s723_s3 = inlined_call_operand.vmem [shape: f32[32,1], index: 3, kind: input, shape index: {}]   ;;  %s724_s5 = inlined_call_operand.vmem [shape: f32[32,1], index: 5, kind: input, shape index: {}]   ;;  %s725_s9 = inlined_call_operand.vmem [shape: f32[4,1], index: 9, kind: input, shape index: {}]   ;;  %s726_s7 = inlined_call_operand.vmem [shape: f32[4,1], index: 7, kind: input, shape index: {}]   ;;  %s727_s4 = inlined_call_operand.vmem [shape: f32[32,32], index: 4, kind: input, shape index: {}]   ;;  %s728_s0 = inlined_call_operand.<no memory space> [shape: f32[1,1], index: 0, kind: input, shape index: {}]   ;;  %s729_s6 = inlined_call_operand.vmem [shape: f32[4,32], index: 6, kind: input, shape index: {}]   ;;  %s730_s8 = inlined_call_operand.vmem [shape: f32[4,32], index: 8, kind: input, shape index: {}]   ;;  %s731_s10 = inlined_call_operand.vmem [shape: f32[4,4], index: 10, kind: output, shape index: {0}]   ;;  %s732_s11 = inlined_call_operand.vmem [shape: f32[4,4], index: 11, kind: output, shape index: {1}]  }
   0x1   :  { %v39_v0 = vld [vmem:[%s721_s1] sm:$0xff]  ;;  %v41_v2 = vld [vmem:[%s722_s2 + $0x8] sm:$0xff]  ;;  %572 = vset.pattern.permute.xlu0 %v576_v3  ;;  %573 = vset.pattern.permute.xlu1 %v576_v3  ;;  %v42_v4 = vld [vmem:[%s722_s2 + $0x10] sm:$0xff]  ;;  %v170_v26 = vstv %s728_s0  ;;  %vm578_vm6 = vmmov 0   ;;  %vm397_vm11 = vcmask 27648  }
   0x2   :  { %v40_v1 = vld [vmem:[%s722_s2] sm:$0xff]  ;;  %525 = vmatprep.subr.mxu0 %v39_v0  ;;  %v47_v5 = vld [vmem:[%s723_s3 + $0x18] sm:$0xff]  ;;  %v45_v6 = vld [vmem:[%s723_s3 + $0x8] sm:$0xff] }
   0x3   :  { %527 = vmatprep.mubr.msk.f32.mxu0 %vm68_vm0, %v40_v1  ;;  %526 = vmatpush3.msra.mxu0 %v39_v0  ;;  %v46_v7 = vld [vmem:[%s723_s3 + $0x10] sm:$0xff]  ;;  %v43_v8 = vld [vmem:[%s722_s2 + $0x18] sm:$0xff]  ;;  %v44_v9 = vld [vmem:[%s723_s3] sm:$0xff] }
   0x4   :  { %65 = vperm.xlu0 %572, %v47_v5   ;;  %528 = vmatmul.mubr.msk.f32.vlgmr.msra.gmra.mxu0 %vm68_vm0, %v41_v2  ;;  %v186_v10 = vld [vmem:[%s724_s5 + $0x18] sm:$0xff]  ;;  %v185_v11 = vld [vmem:[%s724_s5 + $0x10] sm:$0xff]  ;;  %v184_v12 = vld [vmem:[%s724_s5 + $0x8] sm:$0xff] }
   0x5   :  { %55 = vperm.xlu1 %573, %v45_v6   ;;  %530 = vmatprep.mubr.msk.f32.mxu0 %vm68_vm0, %v42_v4  ;;  %v183_v13 = vld [vmem:[%s724_s5] sm:$0xff]  ;;  %v180_v38 = vld [vmem:[%s727_s4 + $0x8] sm:$0xff]  ;;  %v181_v39 = vld [vmem:[%s727_s4 + $0x10] sm:$0xff] }
   0x6   :  { %v400_v14 = vld [vmem:[%s725_s9] sm:$0xf]  ;;  %v182_v40 = vld [vmem:[%s727_s4 + $0x18] sm:$0xff]  ;;  %547 = vmatprep.subr.mxu0 %v577_v41 }
   0x7   :  { %v318_v15 = vld [vmem:[%s726_s7] sm:$0xf] }
   0x8   :  { %60 = vperm.xlu0 %572, %v46_v7   ;;  %531 = vmatmul.mubr.msk.f32.gmra.mxu0 %vm68_vm0, %v43_v8  ;;  %v179_v16 = vld [vmem:[%s727_s4] sm:$0xff] }
   0x9   :  { %50 = vperm.xlu1 %573, %v44_v9   ;;  %541 = vmatprep.mubr.msk.f32.mxu1 %vm207_vm1, %v179_v16  ;;  %v317_v61 = vld [vmem:[%s729_s6] sm:$0xf] }
   0xa   :  { %555 = vmatprep.mubr.msk.f32.mxu0 %vm578_vm6, %v577_v41  ;;  %v399_v62 = vld [vmem:[%s730_s8] sm:$0xf] }
   0xc   :  { %204 = vperm.xlu0 %572, %v186_v10  }
   0xd   :  { %199 = vperm.xlu1 %573, %v185_v11  }
  0x10   :  { %194 = vperm.xlu0 %572, %v184_v12  }
  0x11   :  { %189 = vperm.xlu1 %573, %v183_v13  }
  0x14   :  { %403 = vperm.xlu0 %572, %v400_v14  }
  0x15   :  { %321 = vperm.xlu1 %573, %v318_v15  }
  0x7f   :  { %v66_v17 = vpop.permute.xlu0 %65 }
  0x80   :  { %v56_v18 = vpop.permute.xlu1 %55 }
  0x83   :  { %v61_v22 = vpop.permute.xlu0 %60 }
  0x84   :  { %v51_v25 = vpop.permute.xlu1 %50 }
  0x87   :  { %v205_v42 = vpop.permute.xlu0 %204 }
  0x88   :  { %v200_v43 = vpop.permute.xlu1 %199 }
  0x8b   :  { %v195_v46 = vpop.permute.xlu0 %194 }
  0x8c   :  { %v190_v50 = vpop.permute.xlu1 %189 }
  0x8f   :  { %v404_v0 = vpop.permute.xlu0 %403 }
  0x90   :  { %v322_v1 = vpop.permute.xlu1 %321 }
  0xc4   :  { %v529_v19 = vpop.f32.mrf.mxu0 }
  0xc5   :  { %v153_v23 = vadd.f32 %v529_v19, %v56_v18 }
  0xc6   :  { %v147_v20 = vpop.f32.mrf.mxu0 }
  0xc7   :  { %v148_v28 = vadd.f32 %v147_v20, %v51_v25  ;;  %v172_v31 = vmul.f32 %v170_v26, %v153_v23  ;;  %vm167_vm4 = vcmp.gt.f32.partialorder %v153_v23, 0.0 }
  0xc8   :  { %v532_v21 = vpop.f32.mrf.mxu0 }
  0xc9   :  { %v163_v24 = vadd.f32 %v532_v21, %v66_v17  ;;  %v171_v34 = vmul.f32 %v170_v26, %v148_v28  ;;  %vm166_vm5 = vcmp.gt.f32.partialorder %v148_v28, 0.0  ;;  %v176_v36 = vsel %vm167_vm4, %v153_v23, %v172_v31 }
  0xca   :  { %v157_v27 = vpop.f32.mrf.mxu0 }
  0xcb   :  { %v158_v29 = vadd.f32 %v157_v27, %v61_v22  ;;  %vm169_vm2 = vcmp.gt.f32.partialorder %v163_v24, 0.0  ;;  %v174_v30 = vmul.f32 %v170_v26, %v163_v24  ;;  %v175_v37 = vsel %vm166_vm5, %v148_v28, %v171_v34 }
  0xcd   :  { %v173_v32 = vmul.f32 %v170_v26, %v158_v29  ;;  %v178_v33 = vsel %vm169_vm2, %v163_v24, %v174_v30  ;;  %vm168_vm3 = vcmp.gt.f32.partialorder %v158_v29, 0.0 }
  0xce   :  { %533 = vmatprep.subr.mxu1 %v178_v33 }
  0xcf   :  { %534 = vmatpush3.msra.mxu1 %v178_v33  ;;  %v177_v35 = vsel %vm168_vm3, %v158_v29, %v173_v32 }
  0xd0   :  { %535 = vmatprep.subr.mxu1 %v177_v35 }
  0xd1   :  { %536 = vmatpush3.msra.mxu1 %v177_v35 }
  0xd2   :  { %537 = vmatprep.subr.mxu1 %v176_v36 }
  0xd3   :  { %538 = vmatpush3.msra.mxu1 %v176_v36 }
  0xd4   :  { %539 = vmatprep.subr.mxu1 %v175_v37 }
  0xd5   :  { %540 = vmatpush3.msra.mxu1 %v175_v37 }
  0xd6   :  { %542 = vmatmul.mubr.msk.f32.vlgmr.msra.gmra.mxu1 %vm207_vm1, %v180_v38  ;;  %558 = vmatprep.subr.mxu1 %v577_v41 }
  0xd7   :  { %544 = vmatprep.mubr.msk.f32.mxu1 %vm207_vm1, %v181_v39 }
  0xda   :  { %545 = vmatmul.mubr.msk.f32.gmra.mxu1 %vm207_vm1, %v182_v40 }
  0xdb   :  { %566 = vmatprep.mubr.msk.f32.mxu1 %vm578_vm6, %v577_v41 }
 0x196   :  { %v543_v44 = vpop.f32.mrf.mxu1 }
 0x197   :  { %v292_v48 = vadd.f32 %v543_v44, %v195_v46 }
 0x198   :  { %v286_v45 = vpop.f32.mrf.mxu1 }
 0x199   :  { %v287_v52 = vadd.f32 %v286_v45, %v190_v50  ;;  %v310_v55 = vmul.f32 %v292_v48, %v170_v26  ;;  %vm306_vm9 = vcmp.gt.f32.partialorder %v292_v48, 0.0 }
 0x19a   :  { %v546_v47 = vpop.f32.mrf.mxu1 }
 0x19b   :  { %v302_v49 = vadd.f32 %v546_v47, %v205_v42  ;;  %v309_v58 = vmul.f32 %v287_v52, %v170_v26  ;;  %vm305_vm10 = vcmp.gt.f32.partialorder %v287_v52, 0.0  ;;  %v314_v60 = vsel %vm306_vm9, %v292_v48, %v310_v55 }
 0x19c   :  { %v296_v51 = vpop.f32.mrf.mxu1 }
 0x19d   :  { %vm308_vm7 = vcmp.gt.f32.partialorder %v302_v49, 0.0  ;;  %v312_v53 = vmul.f32 %v302_v49, %v170_v26  ;;  %v297_v54 = vadd.f32 %v296_v51, %v200_v43  ;;  %v313_v63 = vsel %vm305_vm10, %v287_v52, %v309_v58 }
 0x19f   :  { %vm307_vm8 = vcmp.gt.f32.partialorder %v297_v54, 0.0  ;;  %v311_v56 = vmul.f32 %v297_v54, %v170_v26  ;;  %v316_v57 = vsel %vm308_vm7, %v302_v49, %v312_v53 }
 0x1a0   :  { %548 = vmatpush3.msra.mxu0 %v316_v57  ;;  %559 = vmatpush3.msra.mxu1 %v316_v57 }
 0x1a1   :  { %549 = vmatprep.subr.mxu0 %v577_v41  ;;  %560 = vmatprep.subr.mxu1 %v577_v41  ;;  %v315_v59 = vsel %vm307_vm8, %v297_v54, %v311_v56 }
 0x1a2   :  { %550 = vmatpush3.msra.mxu0 %v315_v59  ;;  %561 = vmatpush3.msra.mxu1 %v315_v59 }
 0x1a3   :  { %551 = vmatprep.subr.mxu0 %v577_v41  ;;  %562 = vmatprep.subr.mxu1 %v577_v41 }
 0x1a4   :  { %552 = vmatpush3.msra.mxu0 %v314_v60  ;;  %563 = vmatpush3.msra.mxu1 %v314_v60 }
 0x1a5   :  { %553 = vmatprep.subr.mxu0 %v577_v41  ;;  %564 = vmatprep.subr.mxu1 %v577_v41 }
 0x1a6   :  { %554 = vmatpush3.msra.mxu0 %v313_v63  ;;  %565 = vmatpush3.msra.mxu1 %v313_v63 }
 0x1a7   :  { %556 = vmatmul.mubr.msk.f32.vlgmr.msra.gmra.mxu0 %vm207_vm1, %v317_v61  ;;  %567 = vmatmul.mubr.msk.f32.vlgmr.msra.gmra.mxu1 %vm207_vm1, %v399_v62 }
 0x267   :  { %v393_v2 = vpop.f32.mrf.mxu0  ;;  %v475_v3 = vpop.f32.mrf.mxu1 }
 0x268   :  { %v394_v4 = vadd.f32 %v393_v2, %v322_v1  ;;  %v476_v5 = vadd.f32 %v475_v3, %v404_v0 }
 0x269   :  { %v568_v6 = vpop.f32.mrf.mxu1  ;;  %v557_v7 = vpop.f32.mrf.mxu0 }
 0x26a   :  { %398 = vst.msk [vmem:[%s731_s10] sm:$0xf] %vm397_vm11, %v394_v4  ;;  %v479_v8 = vmax.f32 %v476_v5, -5.0 }
 0x26c   :  { %v480_v9 = vmin.f32 %v479_v8, 2.0 }
 0x26e   :  { %v481_v10 = vmul.f32 1.442695, %v480_v9 }
 0x270   :  { %574 = vpow2.f32 %v481_v10 }
 0x27d   :  { %v575_v11 = vpop.eup %574 }
 0x27e   :  { %483 = vst.msk [vmem:[%s732_s11] sm:$0xf] %vm397_vm11, %v575_v11 }

</bundles_post_ra>
